<compile_context>
chip_gen: v6e
topology: v6e:2x2x1
jax: 0.10.0
libtpu: 0.0.40
codegen_flags: <defaults>
</compile_context>

<pallas_src>
import math

import jax
import jax.numpy as jnp
from jax import lax
from jax.experimental import pallas as pl
from jax.experimental.pallas import tpu as pltpu


def _round_up(x, m):
    return ((x + m - 1) // m) * m


def _vmem_capacity_bytes():
    """Physical VMEM per TensorCore; conservative fallback if query fails."""
    try:
        info = pltpu.get_tpu_info()
        cap = getattr(info, "vmem_capacity_bytes", None)
        if cap:
            return int(cap)
    except Exception:
        pass
    return 64 << 20  # v7x per-TC floor; safe on every generation


def _per_step_vmem_bytes(tb, L, S, LD, H, Pp, Hp):
    """Estimate of one grid step's VMEM footprint, intermediates included."""
    bf, f4 = 2, 4
    # double-buffered activation/output blocks (bf16)
    io = 2 * (tb * L * LD + 3 * tb * S * H + 3 * tb * L * Hp) * bf
    # weights + biases (constant index map, still double-buffered by default)
    w = 2 * ((3 * LD * Pp + 3 * H * Pp + 3 * Pp * Hp) * bf
             + (2 * 3 * Pp + 3 * Hp) * f4)
    # live intermediates for one modality (f32 accumulators + bf16 copies)
    inter = ((tb * L * Pp) * (f4 + bf)           # lp
             + (tb * S * Pp) * (f4 + bf)         # mp
             + (tb * L * S) * (2 * f4 + bf)      # scores, exp, attn
             + (tb * L * Pp) * (f4 + bf)         # feat
             + (tb * L * Hp) * f4)               # out accumulator
    return io + w + inter


def _pick_batch_block(B, L, S, LD, H, Pp, Hp, budget, max_block=64):
    """Largest divisor of B that fits the VMEM budget and keeps >= 2 grid steps.

    TODO(synk): prime B degrades to tb=1 (correct but slow); pad B or use a
    masked last block for such shapes.
    """
    best = 1
    for tb in range(1, min(B, max_block) + 1):
        if B % tb:
            continue
        if B >= 2 and B // tb < 2:
            continue  # keep the 2nd TC busy on v7x + allow DMA/compute overlap
        if _per_step_vmem_bytes(tb, L, S, LD, H, Pp, Hp) <= budget:
            best = tb
    return best


def _lwm_kernel(label_ref, vis_ref, aud_ref, txt_ref,
                wl_ref, bl_ref, ws_ref, bs_ref, wo_ref, bo_ref,
                out_v_ref, out_a_ref, out_t_ref):
    """One grid step = one block of TB batches, all 3 modalities fused."""
    tb, L, LD = label_ref.shape
    S, H = vis_ref.shape[1], vis_ref.shape[2]
    Pp = wl_ref.shape[-1]
    Hp = wo_ref.shape[-1]
    bf16 = jnp.bfloat16

    # Fold the batch block into M for the dense layers (one big matmul each).
    lf2 = label_ref[...].reshape(tb * L, LD)                       # bf16

    modal_refs = (vis_ref, aud_ref, txt_ref)
    out_refs = (out_v_ref, out_a_ref, out_t_ref)

    for i in range(3):                                             # unrolled
        mf2 = modal_refs[i][...].reshape(tb * S, H)                # bf16

        # Dense projections: plain 2D matmuls, MXU bf16 in / f32 accumulate.
        # wl/bl are pre-scaled by 1/sqrt(P) at prepare time (exact algebra:
        # lp only feeds the attention scores).
        lp = jnp.dot(lf2, wl_ref[i],
                     preferred_element_type=jnp.float32) + bl_ref[i]   # (TB*L, Pp)
        mp = jnp.dot(mf2, ws_ref[i],
                     preferred_element_type=jnp.float32) + bs_ref[i]   # (TB*S, Pp)
        lp_b = lp.reshape(tb, L, Pp).astype(bf16)
        mp_b = mp.reshape(tb, S, Pp).astype(bf16)

        # Genuinely batched part: scores (contract last dims, no transpose)
        # and the attention-weighted sum.
        scores = lax.dot_general(lp_b, mp_b, (((2,), (2,)), ((0,), (0,))),
                                 preferred_element_type=jnp.float32)   # (TB, L, S)
        scores = scores - jnp.max(scores, axis=-1, keepdims=True)
        e = jnp.exp(scores)
        denom = jnp.sum(e, axis=-1, keepdims=True)
        attn = (e * pl.reciprocal(denom, approx=True)).astype(bf16)    # EUP recip

        feat = lax.dot_general(attn, mp_b, (((2,), (1,)), ((0,), (0,))),
                               preferred_element_type=jnp.float32)     # (TB, L, Pp)
        feat2 = feat.reshape(tb * L, Pp).astype(bf16)

        # dropout == identity (eval mode)
        out = jnp.dot(feat2, wo_ref[i],
                      preferred_element_type=jnp.float32) + bo_ref[i]  # (TB*L, Hp)
        out_refs[i][...] = out.reshape(tb, L, Hp).astype(out_refs[i].dtype)


def prepare_params(params):
    """One-time weight prep: pad P/H to multiples of 128, cast to bf16, and
    fold 1/sqrt(P) into the label projection. Biases stay f32 (post-MXU add)."""
    P = params["wl"].shape[-1]
    H = params["wo"].shape[-1]
    Pp, Hp = _round_up(P, 128), _round_up(H, 128)
    scale = 1.0 / math.sqrt(P)

    def padw(w, pad_rows, pad_cols):
        return jnp.pad(w, ((0, 0), (0, pad_rows), (0, pad_cols))).astype(jnp.bfloat16)

    def padb(b, pad_cols):
        return jnp.pad(b, ((0, 0), (0, 0), (0, pad_cols))).astype(jnp.float32)

    return {
        "wl": padw(params["wl"] * scale, 0, Pp - P),
        "bl": padb(params["bl"] * scale, Pp - P),
        "ws": padw(params["ws"], 0, Pp - P),
        "bs": padb(params["bs"], Pp - P),
        "wo": padw(params["wo"], Pp - P, Hp - H),
        "bo": padb(params["bo"], Hp - H),
    }


def _as_bf16(x):
    return x if x.dtype == jnp.bfloat16 else x.astype(jnp.bfloat16)


def label_wise_modal_forward(label_features, visual, audio, text, prepared,
                             *, max_batch_block=64):
    """Fused forward of LabelWiseModalModel (eval mode).

    prepared: output of prepare_params() (padded bf16 weights, f32 biases).
    Returns [V_visual, V_audio, V_text], each (B, L, hidden_dim) bfloat16.
    """
    B, L, LD = label_features.shape
    _, S, H = visual.shape
    Pp = prepared["wl"].shape[-1]
    Hp = prepared["wo"].shape[-1]

    lf = _as_bf16(label_features)
    vis, aud, txt = _as_bf16(visual), _as_bf16(audio), _as_bf16(text)

    # Generation-aware tiling: derive the batch block and the scoped-VMEM
    # limit from the chip's actual VMEM capacity (v5e/v6e 128 MiB, v7x 64 MiB).
    cap = _vmem_capacity_bytes()
    budget = int(0.85 * cap)
    tb = _pick_batch_block(B, L, S, LD, H, Pp, Hp, budget, max_batch_block)
    grid = (B // tb,)
    est = _per_step_vmem_bytes(tb, L, S, LD, H, Pp, Hp)
    vmem_limit = int(min(int(0.9 * cap), max(32 << 20, est + (8 << 20))))

    # Weight blocks use a constant block index -> fetched once, not per step.
    def wspec(shape):
        return pl.BlockSpec(shape, lambda b: (0, 0, 0))

    in_specs = [
        pl.BlockSpec((tb, L, LD), lambda b: (b, 0, 0)),   # label features
        pl.BlockSpec((tb, S, H), lambda b: (b, 0, 0)),    # visual
        pl.BlockSpec((tb, S, H), lambda b: (b, 0, 0)),    # audio
        pl.BlockSpec((tb, S, H), lambda b: (b, 0, 0)),    # text
        wspec((3, LD, Pp)), wspec((3, 1, Pp)),            # wl, bl
        wspec((3, H, Pp)),  wspec((3, 1, Pp)),            # ws, bs
        wspec((3, Pp, Hp)), wspec((3, 1, Hp)),            # wo, bo
    ]
    out_specs = [pl.BlockSpec((tb, L, Hp), lambda b: (b, 0, 0)) for _ in range(3)]
    out_shape = [jax.ShapeDtypeStruct((B, L, Hp), jnp.bfloat16) for _ in range(3)]

    outs = pl.pallas_call(
        _lwm_kernel,
        out_shape=out_shape,
        grid_spec=pltpu.PrefetchScalarGridSpec(
            num_scalar_prefetch=0,
            grid=grid,
            in_specs=in_specs,
            out_specs=out_specs,
        ),
        compiler_params=pltpu.CompilerParams(
            dimension_semantics=("parallel",),   # batch-block axis -> 2nd TC on v7x
            vmem_limit_bytes=vmem_limit,
        ),
    )(lf, vis, aud, txt,
      prepared["wl"], prepared["bl"], prepared["ws"],
      prepared["bs"], prepared["wo"], prepared["bo"])

    if Hp == H:
        return list(outs)                        # no pad -> no extra HBM pass
    return [o[:, :, :H] for o in outs]           # bf16 slice: half-byte pass


def init_params(key, label_dim, hidden_dim, pro_dim):
    """PyTorch-Linear-style init, stacked over the 3 modalities.
    Weights stored as (in_dim, out_dim) — i.e. already transposed vs nn.Linear."""
    ks = jax.random.split(key, 6)

    def unif(k, shape, fan_in):
        bound = 1.0 / math.sqrt(fan_in)
        return jax.random.uniform(k, shape, jnp.float32, -bound, bound)

    return {
        "wl": unif(ks[0], (3, label_dim, pro_dim), label_dim),
        "bl": unif(ks[1], (3, 1, pro_dim), label_dim),
        "ws": unif(ks[2], (3, hidden_dim, pro_dim), hidden_dim),
        "bs": unif(ks[3], (3, 1, pro_dim), hidden_dim),
        "wo": unif(ks[4], (3, pro_dim, hidden_dim), pro_dim),
        "bo": unif(ks[5], (3, 1, hidden_dim), pro_dim),
    }


def _reference(label_features, visual, audio, text, params):
    """Pure-JAX f32 reference of the PyTorch forward (dropout = identity)."""
    modals = [visual, audio, text]
    P = params["wl"].shape[-1]
    outs = []
    for i in range(3):
        lp = label_features @ params["wl"][i] + params["bl"][i]
        mp = modals[i] @ params["ws"][i] + params["bs"][i]
        scores = jnp.einsum("blp,bsp->bls", lp, mp) / math.sqrt(P)
        attn = jax.nn.softmax(scores, axis=-1)
        feat = jnp.einsum("bls,bsp->blp", attn, mp)
        outs.append(feat @ params["wo"][i] + params["bo"][i])
    return outs


if __name__ == "__main__":
    B, L, S = 2, 6, 8
    label_dim, hidden_dim, pro_dim = 4, 32, 16

    key = jax.random.PRNGKey(0)
    k_lab, k_v, k_a, k_t, k_p = jax.random.split(key, 5)

    label_features = jax.random.normal(k_lab, (B, L, label_dim), jnp.float32)
    visual = jax.random.normal(k_v, (B, S, hidden_dim), jnp.float32)
    audio = jax.random.normal(k_a, (B, S, hidden_dim), jnp.float32)
    text = jax.random.normal(k_t, (B, S, hidden_dim), jnp.float32)

    params = init_params(k_p, label_dim, hidden_dim, pro_dim)
    prepared = prepare_params(params)        # pad + bf16 + fold 1/sqrt(P), once

    # bf16 activations at the kernel boundary (halves HBM traffic).
    fwd = jax.jit(label_wise_modal_forward)
    vij = fwd(_as_bf16(label_features), _as_bf16(visual), _as_bf16(audio),
              _as_bf16(text), prepared)
    vij = [jax.block_until_ready(v) for v in vij]

    ref = _reference(label_features, visual, audio, text, params)
    for got, want in zip(vij, ref):
        assert got.shape == (B, L, hidden_dim), got.shape
        # bf16 I/O + bf16 MXU inputs + approx reciprocal -> low-order bits only.
        got32 = got.astype(jnp.float32)
        assert jnp.allclose(got32, want, atol=5e-2, rtol=5e-2), \
            float(jnp.max(jnp.abs(got32 - want)))

    print("KERNEL_OK")
</pallas_src>

<mosaic_0001>
module attributes {stable_mosaic.version = 11 : i64} {
  func.func @_lwm_kernel(%arg0: i32, %arg1: memref<1x6x4xbf16, #tpu.memory_space<vmem>>, %arg2: memref<1x8x32xbf16, #tpu.memory_space<vmem>>, %arg3: memref<1x8x32xbf16, #tpu.memory_space<vmem>>, %arg4: memref<1x8x32xbf16, #tpu.memory_space<vmem>>, %arg5: memref<3x4x128xbf16, #tpu.memory_space<vmem>>, %arg6: memref<3x1x128xf32, #tpu.memory_space<vmem>>, %arg7: memref<3x32x128xbf16, #tpu.memory_space<vmem>>, %arg8: memref<3x1x128xf32, #tpu.memory_space<vmem>>, %arg9: memref<3x128x128xbf16, #tpu.memory_space<vmem>>, %arg10: memref<3x1x128xf32, #tpu.memory_space<vmem>>, %arg11: memref<1x6x128xbf16, #tpu.memory_space<vmem>>, %arg12: memref<1x6x128xbf16, #tpu.memory_space<vmem>>, %arg13: memref<1x6x128xbf16, #tpu.memory_space<vmem>>) attributes {dimension_semantics = [#tpu.dimension_semantics<parallel>], iteration_bounds = array<i64: 2>, scalar_prefetch = 0 : i64, scratch_operands = 0 : i64, tpu.core_type = #tpu.core_type<tc>, window_params = [{transform_indices = @transform_0, window_bounds = array<i64: 1, 6, 4>}, {transform_indices = @transform_1, window_bounds = array<i64: 1, 8, 32>}, {transform_indices = @transform_2, window_bounds = array<i64: 1, 8, 32>}, {transform_indices = @transform_3, window_bounds = array<i64: 1, 8, 32>}, {pipeline_mode = #tpu.pipeline_mode<synchronous>, transform_indices = @transform_4, window_bounds = array<i64: 3, 4, 128>}, {pipeline_mode = #tpu.pipeline_mode<synchronous>, transform_indices = @transform_5, window_bounds = array<i64: 3, 1, 128>}, {pipeline_mode = #tpu.pipeline_mode<synchronous>, transform_indices = @transform_6, window_bounds = array<i64: 3, 32, 128>}, {pipeline_mode = #tpu.pipeline_mode<synchronous>, transform_indices = @transform_7, window_bounds = array<i64: 3, 1, 128>}, {pipeline_mode = #tpu.pipeline_mode<synchronous>, transform_indices = @transform_8, window_bounds = array<i64: 3, 128, 128>}, {pipeline_mode = #tpu.pipeline_mode<synchronous>, transform_indices = @transform_9, window_bounds = array<i64: 3, 1, 128>}, {transform_indices = @transform_10, window_bounds = array<i64: 1, 6, 128>}, {transform_indices = @transform_11, window_bounds = array<i64: 1, 6, 128>}, {transform_indices = @transform_12, window_bounds = array<i64: 1, 6, 128>}]} {
    %c0 = arith.constant 0 : index
    %c0_0 = arith.constant 0 : index
    %c0_1 = arith.constant 0 : index
    %0 = vector.load %arg1[%c0, %c0_0, %c0_1] : memref<1x6x4xbf16, #tpu.memory_space<vmem>>, vector<1x6x4xbf16>
    %1 = vector.shape_cast %0 : vector<1x6x4xbf16> to vector<6x4xbf16>
    %c0_2 = arith.constant 0 : index
    %c0_3 = arith.constant 0 : index
    %c0_4 = arith.constant 0 : index
    %2 = vector.load %arg2[%c0_2, %c0_3, %c0_4] : memref<1x8x32xbf16, #tpu.memory_space<vmem>>, vector<1x8x32xbf16>
    %3 = vector.shape_cast %2 : vector<1x8x32xbf16> to vector<8x32xbf16>
    %c0_5 = arith.constant 0 : index
    %c0_6 = arith.constant 0 : index
    %c0_7 = arith.constant 0 : index
    %4 = vector.load %arg5[%c0_5, %c0_6, %c0_7] : memref<3x4x128xbf16, #tpu.memory_space<vmem>>, vector<1x4x128xbf16>
    %5 = vector.shape_cast %4 : vector<1x4x128xbf16> to vector<4x128xbf16>
    %cst = arith.constant dense<0.000000e+00> : vector<6x128xf32>
    %6 = tpu.matmul %1, %5, %cst {dimension_numbers = #tpu.dot_dimension_numbers<[1], [0], [0], [1], [0, 0, 1, 1], [], []>} : vector<6x4xbf16>, vector<4x128xbf16>, vector<6x128xf32> -> vector<6x128xf32>
    %c0_8 = arith.constant 0 : index
    %c0_9 = arith.constant 0 : index
    %c0_10 = arith.constant 0 : index
    %7 = vector.load %arg6[%c0_8, %c0_9, %c0_10] : memref<3x1x128xf32, #tpu.memory_space<vmem>>, vector<1x1x128xf32>
    %8 = vector.shape_cast %7 : vector<1x1x128xf32> to vector<1x128xf32>
    %9 = vector.broadcast %8 : vector<1x128xf32> to vector<6x128xf32>
    %10 = arith.addf %6, %9 : vector<6x128xf32>
    %c0_11 = arith.constant 0 : index
    %c0_12 = arith.constant 0 : index
    %c0_13 = arith.constant 0 : index
    %11 = vector.load %arg7[%c0_11, %c0_12, %c0_13] : memref<3x32x128xbf16, #tpu.memory_space<vmem>>, vector<1x32x128xbf16>
    %12 = vector.shape_cast %11 : vector<1x32x128xbf16> to vector<32x128xbf16>
    %cst_14 = arith.constant dense<0.000000e+00> : vector<8x128xf32>
    %13 = tpu.matmul %3, %12, %cst_14 {dimension_numbers = #tpu.dot_dimension_numbers<[1], [0], [0], [1], [0, 0, 1, 1], [], []>} : vector<8x32xbf16>, vector<32x128xbf16>, vector<8x128xf32> -> vector<8x128xf32>
    %c0_15 = arith.constant 0 : index
    %c0_16 = arith.constant 0 : index
    %c0_17 = arith.constant 0 : index
    %14 = vector.load %arg8[%c0_15, %c0_16, %c0_17] : memref<3x1x128xf32, #tpu.memory_space<vmem>>, vector<1x1x128xf32>
    %15 = vector.shape_cast %14 : vector<1x1x128xf32> to vector<1x128xf32>
    %16 = vector.broadcast %15 : vector<1x128xf32> to vector<8x128xf32>
    %17 = arith.addf %13, %16 : vector<8x128xf32>
    %18 = vector.shape_cast %10 : vector<6x128xf32> to vector<1x6x128xf32>
    %19 = arith.truncf %18 : vector<1x6x128xf32> to vector<1x6x128xbf16>
    %20 = vector.shape_cast %17 : vector<8x128xf32> to vector<1x8x128xf32>
    %21 = arith.truncf %20 : vector<1x8x128xf32> to vector<1x8x128xbf16>
    %cst_18 = arith.constant dense<0.000000e+00> : vector<1x6x8xf32>
    %22 = tpu.matmul %19, %21, %cst_18 {dimension_numbers = #tpu.dot_dimension_numbers<[2], [2], [1], [1], [0, 0, 0, 1, 1, 1], [0], [0]>} : vector<1x6x128xbf16>, vector<1x8x128xbf16>, vector<1x6x8xf32> -> vector<1x6x8xf32>
    %cst_19 = arith.constant dense<0xFF800000> : vector<1x6xf32>
    %23 = vector.multi_reduction <maximumf>, %22, %cst_19 [2] : vector<1x6x8xf32> to vector<1x6xf32>
    %24 = vector.shape_cast %23 : vector<1x6xf32> to vector<1x6x1xf32>
    %25 = vector.broadcast %24 : vector<1x6x1xf32> to vector<1x6x8xf32>
    %26 = arith.subf %22, %25 : vector<1x6x8xf32>
    %27 = math.exp %26 : vector<1x6x8xf32>
    %cst_20 = arith.constant dense<0.000000e+00> : vector<1x6xf32>
    %28 = vector.multi_reduction <add>, %27, %cst_20 [2] : vector<1x6x8xf32> to vector<1x6xf32>
    %29 = vector.shape_cast %28 : vector<1x6xf32> to vector<1x6x1xf32>
    %30 = tpu.reciprocal %29 {approx = true} : vector<1x6x1xf32> -> vector<1x6x1xf32>
    %31 = vector.broadcast %30 : vector<1x6x1xf32> to vector<1x6x8xf32>
    %32 = arith.mulf %27, %31 : vector<1x6x8xf32>
    %33 = arith.truncf %32 : vector<1x6x8xf32> to vector<1x6x8xbf16>
    %cst_21 = arith.constant dense<0.000000e+00> : vector<1x6x128xf32>
    %34 = tpu.matmul %33, %21, %cst_21 {dimension_numbers = #tpu.dot_dimension_numbers<[2], [1], [1], [2], [0, 0, 0, 1, 1, 2], [0], [0]>} : vector<1x6x8xbf16>, vector<1x8x128xbf16>, vector<1x6x128xf32> -> vector<1x6x128xf32>
    %35 = vector.shape_cast %34 : vector<1x6x128xf32> to vector<6x128xf32>
    %36 = arith.truncf %35 : vector<6x128xf32> to vector<6x128xbf16>
    %c0_22 = arith.constant 0 : index
    %c0_23 = arith.constant 0 : index
    %c0_24 = arith.constant 0 : index
    %37 = vector.load %arg9[%c0_22, %c0_23, %c0_24] : memref<3x128x128xbf16, #tpu.memory_space<vmem>>, vector<1x128x128xbf16>
    %38 = vector.shape_cast %37 : vector<1x128x128xbf16> to vector<128x128xbf16>
    %cst_25 = arith.constant dense<0.000000e+00> : vector<6x128xf32>
    %39 = tpu.matmul %36, %38, %cst_25 {dimension_numbers = #tpu.dot_dimension_numbers<[1], [0], [0], [1], [0, 0, 1, 1], [], []>} : vector<6x128xbf16>, vector<128x128xbf16>, vector<6x128xf32> -> vector<6x128xf32>
    %c0_26 = arith.constant 0 : index
    %c0_27 = arith.constant 0 : index
    %c0_28 = arith.constant 0 : index
    %40 = vector.load %arg10[%c0_26, %c0_27, %c0_28] : memref<3x1x128xf32, #tpu.memory_space<vmem>>, vector<1x1x128xf32>
    %41 = vector.shape_cast %40 : vector<1x1x128xf32> to vector<1x128xf32>
    %42 = vector.broadcast %41 : vector<1x128xf32> to vector<6x128xf32>
    %43 = arith.addf %39, %42 : vector<6x128xf32>
    %44 = vector.shape_cast %43 : vector<6x128xf32> to vector<1x6x128xf32>
    %45 = arith.truncf %44 : vector<1x6x128xf32> to vector<1x6x128xbf16>
    %c0_29 = arith.constant 0 : index
    %c0_30 = arith.constant 0 : index
    %c0_31 = arith.constant 0 : index
    %46 = vector.load %arg11[%c0_29, %c0_30, %c0_31] : memref<1x6x128xbf16, #tpu.memory_space<vmem>>, vector<1x6x128xbf16>
    tpu.vector_store %arg11[%c0_29, %c0_30, %c0_31], %45 {strides = array<i32>} : memref<1x6x128xbf16, #tpu.memory_space<vmem>>, vector<1x6x128xbf16>,
    %c0_32 = arith.constant 0 : index
    %c0_33 = arith.constant 0 : index
    %c0_34 = arith.constant 0 : index
    %47 = vector.load %arg3[%c0_32, %c0_33, %c0_34] : memref<1x8x32xbf16, #tpu.memory_space<vmem>>, vector<1x8x32xbf16>
    %48 = vector.shape_cast %47 : vector<1x8x32xbf16> to vector<8x32xbf16>
    %c1 = arith.constant 1 : index
    %c0_35 = arith.constant 0 : index
    %c0_36 = arith.constant 0 : index
    %49 = vector.load %arg5[%c1, %c0_35, %c0_36] : memref<3x4x128xbf16, #tpu.memory_space<vmem>>, vector<1x4x128xbf16>
    %50 = vector.shape_cast %49 : vector<1x4x128xbf16> to vector<4x128xbf16>
    %cst_37 = arith.constant dense<0.000000e+00> : vector<6x128xf32>
    %51 = tpu.matmul %1, %50, %cst_37 {dimension_numbers = #tpu.dot_dimension_numbers<[1], [0], [0], [1], [0, 0, 1, 1], [], []>} : vector<6x4xbf16>, vector<4x128xbf16>, vector<6x128xf32> -> vector<6x128xf32>
    %c1_38 = arith.constant 1 : index
    %c0_39 = arith.constant 0 : index
    %c0_40 = arith.constant 0 : index
    %52 = vector.load %arg6[%c1_38, %c0_39, %c0_40] : memref<3x1x128xf32, #tpu.memory_space<vmem>>, vector<1x1x128xf32>
    %53 = vector.shape_cast %52 : vector<1x1x128xf32> to vector<1x128xf32>
    %54 = vector.broadcast %53 : vector<1x128xf32> to vector<6x128xf32>
    %55 = arith.addf %51, %54 : vector<6x128xf32>
    %c1_41 = arith.constant 1 : index
    %c0_42 = arith.constant 0 : index
    %c0_43 = arith.constant 0 : index
    %56 = vector.load %arg7[%c1_41, %c0_42, %c0_43] : memref<3x32x128xbf16, #tpu.memory_space<vmem>>, vector<1x32x128xbf16>
    %57 = vector.shape_cast %56 : vector<1x32x128xbf16> to vector<32x128xbf16>
    %cst_44 = arith.constant dense<0.000000e+00> : vector<8x128xf32>
    %58 = tpu.matmul %48, %57, %cst_44 {dimension_numbers = #tpu.dot_dimension_numbers<[1], [0], [0], [1], [0, 0, 1, 1], [], []>} : vector<8x32xbf16>, vector<32x128xbf16>, vector<8x128xf32> -> vector<8x128xf32>
    %c1_45 = arith.constant 1 : index
    %c0_46 = arith.constant 0 : index
    %c0_47 = arith.constant 0 : index
    %59 = vector.load %arg8[%c1_45, %c0_46, %c0_47] : memref<3x1x128xf32, #tpu.memory_space<vmem>>, vector<1x1x128xf32>
    %60 = vector.shape_cast %59 : vector<1x1x128xf32> to vector<1x128xf32>
    %61 = vector.broadcast %60 : vector<1x128xf32> to vector<8x128xf32>
    %62 = arith.addf %58, %61 : vector<8x128xf32>
    %63 = vector.shape_cast %55 : vector<6x128xf32> to vector<1x6x128xf32>
    %64 = arith.truncf %63 : vector<1x6x128xf32> to vector<1x6x128xbf16>
    %65 = vector.shape_cast %62 : vector<8x128xf32> to vector<1x8x128xf32>
    %66 = arith.truncf %65 : vector<1x8x128xf32> to vector<1x8x128xbf16>
    %cst_48 = arith.constant dense<0.000000e+00> : vector<1x6x8xf32>
    %67 = tpu.matmul %64, %66, %cst_48 {dimension_numbers = #tpu.dot_dimension_numbers<[2], [2], [1], [1], [0, 0, 0, 1, 1, 1], [0], [0]>} : vector<1x6x128xbf16>, vector<1x8x128xbf16>, vector<1x6x8xf32> -> vector<1x6x8xf32>
    %cst_49 = arith.constant dense<0xFF800000> : vector<1x6xf32>
    %68 = vector.multi_reduction <maximumf>, %67, %cst_49 [2] : vector<1x6x8xf32> to vector<1x6xf32>
    %69 = vector.shape_cast %68 : vector<1x6xf32> to vector<1x6x1xf32>
    %70 = vector.broadcast %69 : vector<1x6x1xf32> to vector<1x6x8xf32>
    %71 = arith.subf %67, %70 : vector<1x6x8xf32>
    %72 = math.exp %71 : vector<1x6x8xf32>
    %cst_50 = arith.constant dense<0.000000e+00> : vector<1x6xf32>
    %73 = vector.multi_reduction <add>, %72, %cst_50 [2] : vector<1x6x8xf32> to vector<1x6xf32>
    %74 = vector.shape_cast %73 : vector<1x6xf32> to vector<1x6x1xf32>
    %75 = tpu.reciprocal %74 {approx = true} : vector<1x6x1xf32> -> vector<1x6x1xf32>
    %76 = vector.broadcast %75 : vector<1x6x1xf32> to vector<1x6x8xf32>
    %77 = arith.mulf %72, %76 : vector<1x6x8xf32>
    %78 = arith.truncf %77 : vector<1x6x8xf32> to vector<1x6x8xbf16>
    %cst_51 = arith.constant dense<0.000000e+00> : vector<1x6x128xf32>
    %79 = tpu.matmul %78, %66, %cst_51 {dimension_numbers = #tpu.dot_dimension_numbers<[2], [1], [1], [2], [0, 0, 0, 1, 1, 2], [0], [0]>} : vector<1x6x8xbf16>, vector<1x8x128xbf16>, vector<1x6x128xf32> -> vector<1x6x128xf32>
    %80 = vector.shape_cast %79 : vector<1x6x128xf32> to vector<6x128xf32>
    %81 = arith.truncf %80 : vector<6x128xf32> to vector<6x128xbf16>
    %c1_52 = arith.constant 1 : index
    %c0_53 = arith.constant 0 : index
    %c0_54 = arith.constant 0 : index
    %82 = vector.load %arg9[%c1_52, %c0_53, %c0_54] : memref<3x128x128xbf16, #tpu.memory_space<vmem>>, vector<1x128x128xbf16>
    %83 = vector.shape_cast %82 : vector<1x128x128xbf16> to vector<128x128xbf16>
    %cst_55 = arith.constant dense<0.000000e+00> : vector<6x128xf32>
    %84 = tpu.matmul %81, %83, %cst_55 {dimension_numbers = #tpu.dot_dimension_numbers<[1], [0], [0], [1], [0, 0, 1, 1], [], []>} : vector<6x128xbf16>, vector<128x128xbf16>, vector<6x128xf32> -> vector<6x128xf32>
    %c1_56 = arith.constant 1 : index
    %c0_57 = arith.constant 0 : index
    %c0_58 = arith.constant 0 : index
    %85 = vector.load %arg10[%c1_56, %c0_57, %c0_58] : memref<3x1x128xf32, #tpu.memory_space<vmem>>, vector<1x1x128xf32>
    %86 = vector.shape_cast %85 : vector<1x1x128xf32> to vector<1x128xf32>
    %87 = vector.broadcast %86 : vector<1x128xf32> to vector<6x128xf32>
    %88 = arith.addf %84, %87 : vector<6x128xf32>
    %89 = vector.shape_cast %88 : vector<6x128xf32> to vector<1x6x128xf32>
    %90 = arith.truncf %89 : vector<1x6x128xf32> to vector<1x6x128xbf16>
    %c0_59 = arith.constant 0 : index
    %c0_60 = arith.constant 0 : index
    %c0_61 = arith.constant 0 : index
    %91 = vector.load %arg12[%c0_59, %c0_60, %c0_61] : memref<1x6x128xbf16, #tpu.memory_space<vmem>>, vector<1x6x128xbf16>
    tpu.vector_store %arg12[%c0_59, %c0_60, %c0_61], %90 {strides = array<i32>} : memref<1x6x128xbf16, #tpu.memory_space<vmem>>, vector<1x6x128xbf16>,
    %c0_62 = arith.constant 0 : index
    %c0_63 = arith.constant 0 : index
    %c0_64 = arith.constant 0 : index
    %92 = vector.load %arg4[%c0_62, %c0_63, %c0_64] : memref<1x8x32xbf16, #tpu.memory_space<vmem>>, vector<1x8x32xbf16>
    %93 = vector.shape_cast %92 : vector<1x8x32xbf16> to vector<8x32xbf16>
    %c2 = arith.constant 2 : index
    %c0_65 = arith.constant 0 : index
    %c0_66 = arith.constant 0 : index
    %94 = vector.load %arg5[%c2, %c0_65, %c0_66] : memref<3x4x128xbf16, #tpu.memory_space<vmem>>, vector<1x4x128xbf16>
    %95 = vector.shape_cast %94 : vector<1x4x128xbf16> to vector<4x128xbf16>
    %cst_67 = arith.constant dense<0.000000e+00> : vector<6x128xf32>
    %96 = tpu.matmul %1, %95, %cst_67 {dimension_numbers = #tpu.dot_dimension_numbers<[1], [0], [0], [1], [0, 0, 1, 1], [], []>} : vector<6x4xbf16>, vector<4x128xbf16>, vector<6x128xf32> -> vector<6x128xf32>
    %c2_68 = arith.constant 2 : index
    %c0_69 = arith.constant 0 : index
    %c0_70 = arith.constant 0 : index
    %97 = vector.load %arg6[%c2_68, %c0_69, %c0_70] : memref<3x1x128xf32, #tpu.memory_space<vmem>>, vector<1x1x128xf32>
    %98 = vector.shape_cast %97 : vector<1x1x128xf32> to vector<1x128xf32>
    %99 = vector.broadcast %98 : vector<1x128xf32> to vector<6x128xf32>
    %100 = arith.addf %96, %99 : vector<6x128xf32>
    %c2_71 = arith.constant 2 : index
    %c0_72 = arith.constant 0 : index
    %c0_73 = arith.constant 0 : index
    %101 = vector.load %arg7[%c2_71, %c0_72, %c0_73] : memref<3x32x128xbf16, #tpu.memory_space<vmem>>, vector<1x32x128xbf16>
    %102 = vector.shape_cast %101 : vector<1x32x128xbf16> to vector<32x128xbf16>
    %cst_74 = arith.constant dense<0.000000e+00> : vector<8x128xf32>
    %103 = tpu.matmul %93, %102, %cst_74 {dimension_numbers = #tpu.dot_dimension_numbers<[1], [0], [0], [1], [0, 0, 1, 1], [], []>} : vector<8x32xbf16>, vector<32x128xbf16>, vector<8x128xf32> -> vector<8x128xf32>
    %c2_75 = arith.constant 2 : index
    %c0_76 = arith.constant 0 : index
    %c0_77 = arith.constant 0 : index
    %104 = vector.load %arg8[%c2_75, %c0_76, %c0_77] : memref<3x1x128xf32, #tpu.memory_space<vmem>>, vector<1x1x128xf32>
    %105 = vector.shape_cast %104 : vector<1x1x128xf32> to vector<1x128xf32>
    %106 = vector.broadcast %105 : vector<1x128xf32> to vector<8x128xf32>
    %107 = arith.addf %103, %106 : vector<8x128xf32>
    %108 = vector.shape_cast %100 : vector<6x128xf32> to vector<1x6x128xf32>
    %109 = arith.truncf %108 : vector<1x6x128xf32> to vector<1x6x128xbf16>
    %110 = vector.shape_cast %107 : vector<8x128xf32> to vector<1x8x128xf32>
    %111 = arith.truncf %110 : vector<1x8x128xf32> to vector<1x8x128xbf16>
    %cst_78 = arith.constant dense<0.000000e+00> : vector<1x6x8xf32>
    %112 = tpu.matmul %109, %111, %cst_78 {dimension_numbers = #tpu.dot_dimension_numbers<[2], [2], [1], [1], [0, 0, 0, 1, 1, 1], [0], [0]>} : vector<1x6x128xbf16>, vector<1x8x128xbf16>, vector<1x6x8xf32> -> vector<1x6x8xf32>
    %cst_79 = arith.constant dense<0xFF800000> : vector<1x6xf32>
    %113 = vector.multi_reduction <maximumf>, %112, %cst_79 [2] : vector<1x6x8xf32> to vector<1x6xf32>
    %114 = vector.shape_cast %113 : vector<1x6xf32> to vector<1x6x1xf32>
    %115 = vector.broadcast %114 : vector<1x6x1xf32> to vector<1x6x8xf32>
    %116 = arith.subf %112, %115 : vector<1x6x8xf32>
    %117 = math.exp %116 : vector<1x6x8xf32>
    %cst_80 = arith.constant dense<0.000000e+00> : vector<1x6xf32>
    %118 = vector.multi_reduction <add>, %117, %cst_80 [2] : vector<1x6x8xf32> to vector<1x6xf32>
    %119 = vector.shape_cast %118 : vector<1x6xf32> to vector<1x6x1xf32>
    %120 = tpu.reciprocal %119 {approx = true} : vector<1x6x1xf32> -> vector<1x6x1xf32>
    %121 = vector.broadcast %120 : vector<1x6x1xf32> to vector<1x6x8xf32>
    %122 = arith.mulf %117, %121 : vector<1x6x8xf32>
    %123 = arith.truncf %122 : vector<1x6x8xf32> to vector<1x6x8xbf16>
    %cst_81 = arith.constant dense<0.000000e+00> : vector<1x6x128xf32>
    %124 = tpu.matmul %123, %111, %cst_81 {dimension_numbers = #tpu.dot_dimension_numbers<[2], [1], [1], [2], [0, 0, 0, 1, 1, 2], [0], [0]>} : vector<1x6x8xbf16>, vector<1x8x128xbf16>, vector<1x6x128xf32> -> vector<1x6x128xf32>
    %125 = vector.shape_cast %124 : vector<1x6x128xf32> to vector<6x128xf32>
    %126 = arith.truncf %125 : vector<6x128xf32> to vector<6x128xbf16>
    %c2_82 = arith.constant 2 : index
    %c0_83 = arith.constant 0 : index
    %c0_84 = arith.constant 0 : index
    %127 = vector.load %arg9[%c2_82, %c0_83, %c0_84] : memref<3x128x128xbf16, #tpu.memory_space<vmem>>, vector<1x128x128xbf16>
    %128 = vector.shape_cast %127 : vector<1x128x128xbf16> to vector<128x128xbf16>
    %cst_85 = arith.constant dense<0.000000e+00> : vector<6x128xf32>
    %129 = tpu.matmul %126, %128, %cst_85 {dimension_numbers = #tpu.dot_dimension_numbers<[1], [0], [0], [1], [0, 0, 1, 1], [], []>} : vector<6x128xbf16>, vector<128x128xbf16>, vector<6x128xf32> -> vector<6x128xf32>
    %c2_86 = arith.constant 2 : index
    %c0_87 = arith.constant 0 : index
    %c0_88 = arith.constant 0 : index
    %130 = vector.load %arg10[%c2_86, %c0_87, %c0_88] : memref<3x1x128xf32, #tpu.memory_space<vmem>>, vector<1x1x128xf32>
    %131 = vector.shape_cast %130 : vector<1x1x128xf32> to vector<1x128xf32>
    %132 = vector.broadcast %131 : vector<1x128xf32> to vector<6x128xf32>
    %133 = arith.addf %129, %132 : vector<6x128xf32>
    %134 = vector.shape_cast %133 : vector<6x128xf32> to vector<1x6x128xf32>
    %135 = arith.truncf %134 : vector<1x6x128xf32> to vector<1x6x128xbf16>
    %c0_89 = arith.constant 0 : index
    %c0_90 = arith.constant 0 : index
    %c0_91 = arith.constant 0 : index
    %136 = vector.load %arg13[%c0_89, %c0_90, %c0_91] : memref<1x6x128xbf16, #tpu.memory_space<vmem>>, vector<1x6x128xbf16>
    tpu.vector_store %arg13[%c0_89, %c0_90, %c0_91], %135 {strides = array<i32>} : memref<1x6x128xbf16, #tpu.memory_space<vmem>>, vector<1x6x128xbf16>,
    return
  }
  func.func @transform_0(%arg0: i32) -> (i32, i32, i32) {
    %c0_i32 = arith.constant 0 : i32
    %c0_i32_0 = arith.constant 0 : i32
    %c0_i32_1 = arith.constant 0 : i32
    return %arg0, %c0_i32, %c0_i32_0 : i32, i32, i32
  }
  func.func @transform_1(%arg0: i32) -> (i32, i32, i32) {
    %c0_i32 = arith.constant 0 : i32
    %c0_i32_0 = arith.constant 0 : i32
    %c0_i32_1 = arith.constant 0 : i32
    return %arg0, %c0_i32, %c0_i32_0 : i32, i32, i32
  }
  func.func @transform_2(%arg0: i32) -> (i32, i32, i32) {
    %c0_i32 = arith.constant 0 : i32
    %c0_i32_0 = arith.constant 0 : i32
    %c0_i32_1 = arith.constant 0 : i32
    return %arg0, %c0_i32, %c0_i32_0 : i32, i32, i32
  }
  func.func @transform_3(%arg0: i32) -> (i32, i32, i32) {
    %c0_i32 = arith.constant 0 : i32
    %c0_i32_0 = arith.constant 0 : i32
    %c0_i32_1 = arith.constant 0 : i32
    return %arg0, %c0_i32, %c0_i32_0 : i32, i32, i32
  }
  func.func @transform_4(%arg0: i32) -> (i32, i32, i32) {
    %c0_i32 = arith.constant 0 : i32
    %c0_i32_0 = arith.constant 0 : i32
    %c0_i32_1 = arith.constant 0 : i32
    %c0_i32_2 = arith.constant 0 : i32
    return %c0_i32, %c0_i32_0, %c0_i32_1 : i32, i32, i32
  }
  func.func @transform_5(%arg0: i32) -> (i32, i32, i32) {
    %c0_i32 = arith.constant 0 : i32
    %c0_i32_0 = arith.constant 0 : i32
    %c0_i32_1 = arith.constant 0 : i32
    %c0_i32_2 = arith.constant 0 : i32
    return %c0_i32, %c0_i32_0, %c0_i32_1 : i32, i32, i32
  }
  func.func @transform_6(%arg0: i32) -> (i32, i32, i32) {
    %c0_i32 = arith.constant 0 : i32
    %c0_i32_0 = arith.constant 0 : i32
    %c0_i32_1 = arith.constant 0 : i32
    %c0_i32_2 = arith.constant 0 : i32
    return %c0_i32, %c0_i32_0, %c0_i32_1 : i32, i32, i32
  }
  func.func @transform_7(%arg0: i32) -> (i32, i32, i32) {
    %c0_i32 = arith.constant 0 : i32
    %c0_i32_0 = arith.constant 0 : i32
    %c0_i32_1 = arith.constant 0 : i32
    %c0_i32_2 = arith.constant 0 : i32
    return %c0_i32, %c0_i32_0, %c0_i32_1 : i32, i32, i32
  }
  func.func @transform_8(%arg0: i32) -> (i32, i32, i32) {
    %c0_i32 = arith.constant 0 : i32
    %c0_i32_0 = arith.constant 0 : i32
    %c0_i32_1 = arith.constant 0 : i32
    %c0_i32_2 = arith.constant 0 : i32
    return %c0_i32, %c0_i32_0, %c0_i32_1 : i32, i32, i32
  }
  func.func @transform_9(%arg0: i32) -> (i32, i32, i32) {
    %c0_i32 = arith.constant 0 : i32
    %c0_i32_0 = arith.constant 0 : i32
    %c0_i32_1 = arith.constant 0 : i32
    %c0_i32_2 = arith.constant 0 : i32
    return %c0_i32, %c0_i32_0, %c0_i32_1 : i32, i32, i32
  }
  func.func @transform_10(%arg0: i32) -> (i32, i32, i32) {
    %c0_i32 = arith.constant 0 : i32
    %c0_i32_0 = arith.constant 0 : i32
    %c0_i32_1 = arith.constant 0 : i32
    return %arg0, %c0_i32, %c0_i32_0 : i32, i32, i32
  }
  func.func @transform_11(%arg0: i32) -> (i32, i32, i32) {
    %c0_i32 = arith.constant 0 : i32
    %c0_i32_0 = arith.constant 0 : i32
    %c0_i32_1 = arith.constant 0 : i32
    return %arg0, %c0_i32, %c0_i32_0 : i32, i32, i32
  }
  func.func @transform_12(%arg0: i32) -> (i32, i32, i32) {
    %c0_i32 = arith.constant 0 : i32
    %c0_i32_0 = arith.constant 0 : i32
    %c0_i32_1 = arith.constant 0 : i32
    return %arg0, %c0_i32, %c0_i32_0 : i32, i32, i32
  }
}

</mosaic_0001>

<bundles_post_ra>
// kernel: label_wise_modal_forward.1
= control target key start
LH: loop header
LB: loop body
LE: loop exit
PB: predicated region body
PF: predicated region fallthrough
CT: control target
= control target key end

     0   :  { %s2810_s0 = inlined_call_operand.vmem [shape: bf16[2,6,4], index: 0, kind: input, shape index: {}]   ;;  %s2811_s1 = inlined_call_operand.vmem [shape: bf16[2,8,32], index: 1, kind: input, shape index: {}]   ;;  %s2812_s2 = inlined_call_operand.hbm [shape: bf16[2,8,32], index: 2, kind: input, shape index: {}]   ;;  %s2813_s3 = inlined_call_operand.vmem [shape: bf16[2,8,32], index: 3, kind: input, shape index: {}]   ;;  %s2814_s4 = inlined_call_operand.vmem [shape: bf16[3,4,128], index: 4, kind: input, shape index: {}]   ;;  %s2815_s5 = inlined_call_operand.hbm [shape: f32[3,1,128], index: 5, kind: input, shape index: {}]   ;;  %s2816_s6 = inlined_call_operand.hbm [shape: bf16[3,32,128], index: 6, kind: input, shape index: {}]   ;;  %s2817_s7 = inlined_call_operand.hbm [shape: f32[3,1,128], index: 7, kind: input, shape index: {}]   ;;  %s2818_s8 = inlined_call_operand.hbm [shape: bf16[3,128,128], index: 8, kind: input, shape index: {}]   ;;  %s2819_s9 = inlined_call_operand.hbm [shape: f32[3,1,128], index: 9, kind: input, shape index: {}]   ;;  %s2820_s10 = inlined_call_operand.vmem [shape: bf16[2,6,128], index: 10, kind: output, shape index: {0}]   ;;  %s2821_s11 = inlined_call_operand.vmem [shape: bf16[2,6,128], index: 11, kind: output, shape index: {1}]   ;;  %s2822_s12 = inlined_call_operand.vmem [shape: bf16[2,6,128], index: 12, kind: output, shape index: {2}]  }
   0x1   :  { %2828 = sst [smem:[#allocation16_spill]] %s2815_s5 }
   0x2   :  { %2829 = sst [smem:[#allocation17_spill]] %s2816_s6 }
   0x3   :  { %2830 = sst [smem:[#allocation18_spill]] %s2817_s7 }
   0x4   :  { %18 = vsyncpa [#allocation3], 0 }
   0x5   :  { %20 = vsyncpa [#allocation3 + $0x1], 0 }
   0x6   :  { %21 = vsyncpa [#allocation5], 0 }
   0x7   :  { %22 = vsyncpa [#allocation8], 0 }
   0x8   :  { %23 = vsyncpa [#allocation11], 0  ;;  %s2492_s21 = smov 0   ;;  %s2494_s22 = smov 0  }
   0x9   :  { %s2496_s23 = smov 0   ;;  %s2498_s24 = smov 0  }
   0xa LB: > { %s2415_s25 = smov [#allocation4]   ;;  %s2513_s27 = sadd.s32 4294967295, %s2413_s24   ;;  %s2413_s24 = sphi %s2498_s24, %s2853_s24   ;;  %s2409_s23 = sphi %s2496_s23, %s2852_s23   ;;  %s2405_s22 = sphi %s2494_s22, %s2851_s22   ;;  %s2401_s21 = sphi %s2492_s21, %s2850_s21  }
   0xb   : > { %s357_s26 = sshll.u32 %s2415_s25, 4  ;;  %p1805_p0 = scmp.ge.s32.totalorder %s2413_s24, 1  ;;  %s358_s26 = int_to_ptr.vmem [resolvable:$true] %s357_s26 }
   0xc   : > { %p2825_p1 = scmp.eq.s32.totalorder %s2513_s27, 0  ;;  %p342_p2 = scmp.lt.s32.totalorder %s2413_s24, 3 }
   0xd   : > { %s2416_s29 = smov [#allocation7]   ;;  %s2417_s14 = smov [#allocation6]  }
   0xe   : > { %p2518_p3 = pnand %p1805_p0, %p342_p2  ;;  %s383_s30 = sshll.u32 %s2416_s29, 4  ;;  %s2530_s30 = int_to_ptr.vmem [resolvable:$true] %s383_s30 }
   0xf   : > { %s370_s15 = sshll.u32 %s2417_s14, 4  ;;  %s2220_s17 = scalar_lea.vmem %s358_s26, 48  ;;  %s2532_s15 = int_to_ptr.vmem [resolvable:$true] %s370_s15 }
  0x10   : > { %s2831_s28 = scalar_select %p2518_p3, 1, 0 }
  0x11   : > { %p2093_p4 = pneg %p2518_p3  ;;  %p2221_p7 = scmp.ne.s32.totalorder %s358_s26, %s2220_s17 }
  0x12   : > { %s2227_s18 = scalar_lea.vmem %s358_s26, 64  ;;  %p2228_p10 = scmp.lt.s32.totalorder %s358_s26, %s358_s26 }
  0x13   : > { %p2526_p5 = pnand %p2093_p4, %p2825_p1  ;;  %p2229_p11 = scmp.lt.s32.totalorder %s2227_s18, %s2220_s17 }
  0x15   : > { %p2536_p6 = pneg %p2526_p5  ;;  %p2230_p12 = por %p2229_p11, %p2228_p10 }
  0x17   : > { %p2223_p8 = pnand %p2221_p7, %p2536_p6 }
  0x19   : > { %p2224_p9 = pneg %p2223_p8 }
  0x1b   : > { %p2231_p13 = pnand %p2230_p12, %p2224_p9 }
  0x1d   : > { %2234 = shalt.err (!%p2231_p13)
}
  0x1e   : > { %s2823_s19 = smov 16   ;;  %s2824_s20 = smov 1  }
  0x1f   : > { %s2834_s5 = sld [smem:[#allocation16_spill]]  ;;  %s2246_s14 = scalar_lea.vmem %s2530_s30, 48 }
  0x20   : > { %p2247_p0 = scmp.ne.s32.totalorder %s2530_s30, %s2246_s14  ;;  %s2253_s17 = scalar_lea.vmem %s2530_s30, 64 }
  0x21   : > { %p2254_p7 = scmp.lt.s32.totalorder %s2530_s30, %s2530_s30  ;;  %p2255_p8 = scmp.lt.s32.totalorder %s2253_s17, %s2246_s14 }
  0x22   : > { %p2249_p2 = pnand %p2247_p0, %p2536_p6 }
  0x23   : > { %p2256_p9 = por %p2255_p8, %p2254_p7 }
  0x24   : > { %p2250_p4 = pneg %p2249_p2 }
  0x25   : > { %2096 = dma.hbm_to_vmem [thread:$0]  (!%p2526_p5), %s2834_s5, 48, %s358_s26, [#allocation5], %s2823_s19, %s2823_s19, %s2824_s20  }
  0x26   : > { %p2257_p10 = pnand %p2256_p9, %p2250_p4 }
  0x28   : > { %2260 = shalt.err (!%p2257_p10)
}
  0x29   : > { %s2835_s7 = sld [smem:[#allocation18_spill]]  ;;  %s2272_s25 = scalar_lea.vmem %s2532_s15, 768 }
  0x2a   : > { %p2273_p11 = scmp.ne.s32.totalorder %s2532_s15, %s2272_s25  ;;  %p2280_p0 = scmp.lt.s32.totalorder %s2532_s15, %s2532_s15 }
  0x2b   : > { %p2281_p2 = scmp.lt.s32.totalorder %s2272_s25, %s2272_s25 }
  0x2c   : > { %p2275_p12 = pnand %p2273_p11, %p2536_p6 }
  0x2d   : > { %p2282_p4 = por %p2281_p2, %p2280_p0 }
  0x2e   : > { %p2276_p13 = pneg %p2275_p12 }
  0x2f   : > { %2102 = dma.hbm_to_vmem [thread:$0]  (!%p2526_p5), %s2835_s7, 48, %s2530_s30, [#allocation8], %s2823_s19, %s2823_s19, %s2824_s20  }
  0x30   : > { %p2283_p7 = pnand %p2282_p4, %p2276_p13 }
  0x32   : > { %2286 = shalt.err (!%p2283_p7)
}
  0x33   : > { %s2420_s29 = smov 64   ;;  %s2421_s14 = smov 4  }
  0x34   : > { %s2836_s6 = sld [smem:[#allocation17_spill]]  ;;  %s2422_s30 = smov [#allocation9]  }
  0x35   : > { %s396_s26 = sshll.u32 %s2422_s30, 4  ;;  %s2423_s19 = smov [#allocation10]   ;;  %s397_s26 = int_to_ptr.vmem [resolvable:$true] %s396_s26 }
  0x36   : > { %s409_s20 = sshll.u32 %s2423_s19, 4  ;;  %s2298_s5 = scalar_lea.vmem %s397_s26, 3072  ;;  %s410_s20 = int_to_ptr.vmem [resolvable:$true] %s409_s20 }
  0x37   : > { %p2299_p8 = scmp.ne.s32.totalorder %s397_s26, %s2298_s5  ;;  %p2306_p11 = scmp.lt.s32.totalorder %s397_s26, %s397_s26 }
  0x38   : > { %p2307_p12 = scmp.lt.s32.totalorder %s2298_s5, %s2298_s5 }
  0x39   : > { %p2301_p9 = pnand %p2299_p8, %p2536_p6 }
  0x3a   : > { %2099 = dma.hbm_to_vmem [thread:$0]  (!%p2526_p5), %s2836_s6, 768, %s2532_s15, [#allocation5], %s2420_s29, %s2420_s29, %s2421_s14  }
  0x3b   : > { %p2302_p10 = pneg %p2301_p9  ;;  %p2308_p13 = por %p2307_p12, %p2306_p11 }
  0x3d   : > { %p2309_p0 = pnand %p2308_p13, %p2302_p10 }
  0x3f   : > { %2312 = shalt.err (!%p2309_p0)
}
  0x40   : > { %2105 = dma.hbm_to_vmem [thread:$0]  (!%p2526_p5), %s2818_s8, 3072, %s397_s26, [#allocation8], %s2420_s29, %s2420_s29, %s2421_s14  }
  0x41   : > { %s2324_s15 = scalar_lea.vmem %s410_s20, 48  ;;  %s2331_s19 = scalar_lea.vmem %s410_s20, 64 }
  0x42   : > { %p2325_p2 = scmp.ne.s32.totalorder %s410_s20, %s2324_s15  ;;  %p2332_p8 = scmp.lt.s32.totalorder %s410_s20, %s410_s20 }
  0x43   : > { %p2333_p9 = scmp.lt.s32.totalorder %s2331_s19, %s2324_s15 }
  0x44   : > { %p2327_p4 = pnand %p2325_p2, %p2536_p6 }
  0x45   : > { %p2334_p1 = por %p2333_p9, %p2332_p8 }
  0x46   : > { %p2328_p7 = pneg %p2327_p4 }
  0x48   : > { %p2335_p11 = pnand %p2334_p1, %p2328_p7 }
  0x4a   : > { %2338 = shalt.err (!%p2335_p11)
}
  0x4b   : > { %s2837_s5 = smov 1   ;;  %s2838_s18 = smov 16  }
  0x4c   : > { %2108 = dma.hbm_to_vmem [thread:$0]  (!%p2526_p5), %s2819_s9, 48, %s410_s20, [#allocation11], %s2838_s18, %s2838_s18, %s2837_s5  }
  0x4d   : > { %s2596_s13 = sadd.s32 1, %s2413_s24   ;;  %s88_s29 = sadd.s32 1, %s2409_s23 }
  0x4e   : > { %s85_s16 = ssub.s32 %s2413_s24, %s2596_s13  ;;  %p95_p6 = scmp.ne.s32.totalorder %s2409_s23, %s2405_s22 }
  0x4f   : > { %p86_p1 = scmp.eq.s32.totalorder %s85_s16, 0  ;;  %p96_p10 = scmp.eq.s32.totalorder %s2413_s24, 0 }
  0x50   : > { %p101_p12 = scmp.ne.s32.totalorder %s2405_s22, %s2401_s21  ;;  %p2839_p0 = scmp.eq.s32.totalorder %s2513_s27, 0 }
  0x51   : > { %s2607_s14 = scalar_select %p86_p1, %s2409_s23, %s88_s29  }
  0x52   : > { %p97_p13 = por %p96_p10, %p95_p6  ;;  %p2611_p2 = por %p2839_p0, %p101_p12 }
  0x53   : > { %p2118_p4 = scmp.lt.s32.totalorder %s2413_s24, 2  ;;  %s437_s17 = sand.u32 1, %s2409_s23  }
  0x54   : > { %s2840_s26 = scalar_select %p2611_p2, 1, 0 }
  0x55   : > { %s1812_s20 = sshll.u32 %s437_s17, 2  ;;  %s1813_s15 = sshll.u32 %s2413_s24, 6 }
  0x56   : > { %s2621_s18 = scalar_lea.hbm %s2812_s2, %s1813_s15  ;;  %s441_s21 = scalar_lea.vmem [#allocation2], %s1812_s20 }
  0x57   : > { %s448_s30 = sshll.u32 %s441_s21, 4  ;;  %p2623_p5 = pnand %p2118_p4, %p97_p13  ;;  %s449_s30 = int_to_ptr.vmem [resolvable:$true] %s448_s30 }
  0x58   : > { %s438_s16 = scalar_lea.sflag [#allocation3], %s437_s17  ;;  %s2339_s29 = scalar_lea.hbm %s2621_s18, 64 }
  0x59   : > { %p2340_p7 = scmp.ne.s32.totalorder %s2621_s18, %s2339_s29  ;;  %p2341_p8 = pneg %p2623_p5 }
  0x5a   : > { %s2344_s19 = scalar_lea.hbm %s2812_s2, 128  ;;  %p2345_p1 = scmp.lt.s32.totalorder %s2621_s18, %s2812_s2 }
  0x5b   : > { %p2342_p9 = pnand %p2341_p8, %p2340_p7  ;;  %p2346_p6 = scmp.lt.s32.totalorder %s2344_s19, %s2339_s29 }
  0x5d   : > { %p2343_p11 = pneg %p2342_p9  ;;  %p2347_p10 = por %p2346_p6, %p2345_p1 }
  0x5f   : > { %p2348_p12 = pnand %p2347_p10, %p2343_p11 }
  0x61   : > { %2351 = shalt.err (!%p2348_p12)
}
  0x62   : > { %s2352_s21 = scalar_lea.vmem %s449_s30, 64  ;;  %s2424_s17 = smov [#allocation2]  }
  0x63   : > { %p2353_p13 = scmp.ne.s32.totalorder %s449_s30, %s2352_s21  ;;  %s2357_s6 = sshll.u32 %s2424_s17, 4  ;;  %s2358_s6 = int_to_ptr.vmem [resolvable:$false] %s2357_s6 }
  0x64   : > { %s2359_s7 = scalar_lea.vmem %s2358_s6, 128  ;;  %p2360_p7 = scmp.lt.s32.totalorder %s449_s30, %s2358_s6 }
  0x65   : > { %p2355_p0 = pnand %p2353_p13, %p2341_p8  ;;  %p2361_p9 = scmp.lt.s32.totalorder %s2359_s7, %s2352_s21 }
  0x67   : > { %p2356_p4 = pneg %p2355_p0  ;;  %p2362_p2 = por %p2361_p9, %p2360_p7 }
  0x69   : > { %p2363_p3 = pnand %p2362_p2, %p2356_p4 }
  0x6b   : > { %2366 = shalt.err (!%p2363_p3)
}
  0x6c   : > { %2112 = dma.hbm_to_vmem [thread:$0]  (!%p2623_p5), %s2621_s18, 64, %s449_s30, %s438_s16  }
  0x6d   : > { %p2842_p11 = scmp.ne.s32.totalorder %s2831_s28, 0 }
  0x6e   : > { %s466_s29 = sand.u32 (!%p2842_p11), 1, %s2405_s22   ;;  %p2843_p8 = scmp.ne.s32.totalorder (!%p2842_p11), %s2840_s26, 0 }
  0x6f   : > { %464 = sbr.rel (%p2842_p11) target bundleno = 2700 (0xa8c), region = 60  ;;  %s2644_s24 = sshll.u32 (!%p2842_p11), %s466_s29, 2 }
  0x70   : > { %s467_s15 = scalar_lea.sflag (!%p2842_p11), [#allocation3], %s466_s29  ;;  %s470_s19 = scalar_lea.vmem (!%p2842_p11), [#allocation2], %s2644_s24 }
  0x74   : > { %2384 = dma.done.wait (%p2843_p8), %s467_s15, 64  }
  0x75   : > { %2386 = vsyncadd (%p2843_p8), %s467_s15, 4294967232  ;;  %p2844_p3 = scmp.eq.s32.totalorder %s2513_s27, 0 }
  0x77   : > { %2388 = dma.done.wait (%p2844_p3), [#allocation5], 816   ;;  %p2845_p2 = pmov %p2844_p3 }
  0x79   : > { %2390 = vsyncadd (%p2845_p2), [#allocation5], 4294966480  ;;  %p2846_p5 = pmov %p2845_p2 }
  0x7a   : > { %p2847_p1 = pmov %p2845_p2 }
  0x7b   : > { %2392 = dma.done.wait (%p2846_p5), [#allocation8], 3120  }
  0x7c   : > { %2394 = vsyncadd (%p2847_p1), [#allocation8], 4294964176  ;;  %p2848_p6 = pmov %p2847_p1 }
  0x7d   : > { %p2849_p10 = pmov %p2847_p1 }
  0x7e   : > { %2396 = dma.done.wait (%p2848_p6), [#allocation11], 48  }
  0x7f   : > { %2398 = vsyncadd (%p2849_p10), [#allocation11], 4294967248  ;;  %p550_p12 = scmp.lt.s32.totalorder %s2513_s27, 1  ;;  %v2425_v0 = vmov 0.0   ;;  %vm2426_vm0 = vmmov 0   ;;  %vm589_vm1 = vcmask 1041408  }
  0x80   : > { %1933 = vmatprep.subr.bf16.mxu1 %v2425_v0  ;;  %1935 = vmatprep.mubr.msk.bf16.mxu1 %vm2426_vm0, %v2425_v0  ;;  %v577_v1 = vld [vmem:[%s2814_s4] sm:$0x3]  ;;  %vm585_vm2 = vcmask 31744   ;;  %v2167_v4 = vld [vmem:[#allocation6 + $0x8] sm:$0xff]   ;;  %vm656_vm3 = vcmask 261120   ;;  %v2168_v5 = vld [vmem:[#allocation6] sm:$0xff]  }
  0x81   : > { %s2855_s27 = smov (!%p550_p12, %s2513_s27), 1  ;;  %1959 = vmatprep.subr.bf16.mxu0 %v2425_v0  ;;  %1975 = vmatprep.mubr.msk.bf16.mxu0 %vm2426_vm0, %v2425_v0  ;;  %v591_v2 = vsel %vm589_vm1, %v577_v1, 0  ;;  %v1829_v11 = vld [vmem:[#allocation7] ss:$0 sm:$0xff]  ;;  %v1827_v15 = vld [vmem:[#allocation4] ss:$0 sm:$0xff] }
  0x82   : > { %s2671_s6 = sshll.u32 %s2855_s27, 2  ;;  %1934 = vmatpush3.bf16.msra.mxu1 %v591_v2  ;;  %vm759_vm4 = vcmask 1043456   ;;  %vm742_vm5 = vcmask 62464   ;;  %v2171_v32 = vld [vmem:[#allocation9 + $0x38] sm:$0xff]   ;;  %v2172_v33 = vld [vmem:[#allocation9 + $0x30] sm:$0xff]   ;;  %v2173_v34 = vld [vmem:[#allocation9 + $0x28] sm:$0xff]  }
  0x83   : > { %s553_s26 = scalar_lea.vmem %s2810_s0, %s2671_s6  ;;  %1939 = vmatprep.subr.bf16.mxu1 %v2425_v0  ;;  %s557_s16 = scalar_lea.vmem %s2811_s1, %s2671_s6  ;;  %1960 = vmatpush3.bf16.msra.mxu0 %v2171_v32  ;;  %v2174_v35 = vld [vmem:[#allocation9 + $0x20] sm:$0xff]   ;;  %v2175_v36 = vld [vmem:[#allocation9 + $0x18] sm:$0xff]   ;;  %v2176_v37 = vld [vmem:[#allocation9 + $0x10] sm:$0xff]   ;;  %vm755_vm6 = vcmask 64512  }
  0x84   : > { %v2681_v3 = vld [vmem:[%s553_s26] sm:$0x7]  ;;  %1961 = vmatprep.subr.bf16.mxu0 %v2425_v0  ;;  %v2177_v38 = vld [vmem:[#allocation9 + $0x8] sm:$0xff]   ;;  %v1846_v58 = vld [vmem:[#allocation7 + $0x1] ss:$0 sm:$0xff]  ;;  %s565_s29 = scalar_lea.vmem %s2820_s10, %s2671_s6  ;;  %s561_s28 = scalar_lea.vmem %s2813_s3, %s2671_s6 }
  0x85   : > { %1936 = vmatmul.mubr.msk.bf16.vlgmr.msra.gmra.mxu1 %vm585_vm2, %v2681_v3  ;;  %v576_v6 = vld [vmem:[%s557_s16] sm:$0xf]  ;;  %v2169_v45 = vld [vmem:[#allocation6 + $0x18] sm:$0xff]   ;;  %s569_s30 = scalar_lea.vmem %s2821_s11, %s2671_s6  ;;  %s573_s16 = scalar_lea.vmem %s2822_s12, %s2671_s6 }
  0x86   : > { %1940 = vmatpush3.bf16.msra.mxu1 %v2167_v4  ;;  %1943 = vmatprep.mubr.msk.bf16.mxu1 %vm2426_vm0, %v2425_v0  ;;  %v1843_v41 = vld [vmem:[%s2814_s4 + $0x2] sm:$0x3]  ;;  %v1844_v62 = vld [vmem:[#allocation4 + $0x1] ss:$0 sm:$0xff] }
  0x87   : > { %1941 = vmatprep.subr.bf16.mxu1 %v2425_v0  ;;  %1962 = vmatpush3.bf16.msra.mxu0 %v2172_v33  ;;  %v929_v44 = vsel %vm589_vm1, %v1843_v41, 0  ;;  %v2170_v46 = vld [vmem:[#allocation6 + $0x10] sm:$0xff]   ;;  %v1860_v33 = vld [vmem:[%s2814_s4 + $0x4] sm:$0x3] }
  0x88   : > { %1963 = vmatprep.subr.bf16.mxu0 %v2425_v0  ;;  %v917_v47 = vld [vmem:[%s470_s19] sm:$0xf] }
  0x89   : > { %v2178_v48 = vld [vmem:[#allocation9] sm:$0xff]  }
  0x8a   : > { %1942 = vmatpush3.bf16.msra.mxu1 %v2168_v5 }
  0x8b   : > { %1947 = vmatprep.subr.bf16.mxu1 %v2425_v0  ;;  %1964 = vmatpush3.bf16.msra.mxu0 %v2173_v34 }
  0x8c   : > { %1965 = vmatprep.subr.bf16.mxu0 %v2425_v0 }
  0x8d   : > { %1944 = vmatmul.mubr.msk.bf16.vlgmr.msra.gmra.mxu1 %vm656_vm3, %v576_v6 }
  0x8e   : > { %1949 = vmatprep.mubr.msk.bf16.mxu1 %vm2426_vm0, %v2425_v0 }
  0x8f   : > { %1966 = vmatpush3.bf16.msra.mxu0 %v2174_v35 }
  0x90   : > { %1967 = vmatprep.subr.bf16.mxu0 %v2425_v0 }
  0x93   : > { %1968 = vmatpush3.bf16.msra.mxu0 %v2175_v36  ;;  %v1267_v36 = vsel %vm589_vm1, %v1860_v33, 0 }
  0x94   : > { %1969 = vmatprep.subr.bf16.mxu0 %v2425_v0 }
  0x97   : > { %1970 = vmatpush3.bf16.msra.mxu0 %v2176_v37  ;;  %v2179_v37 = vld [vmem:[#allocation6 + $0x28] sm:$0xff]  }
  0x98   : > { %1971 = vmatprep.subr.bf16.mxu0 %v2425_v0 }
  0x9b   : > { %1972 = vmatpush3.bf16.msra.mxu0 %v2177_v38  ;;  %v2180_v38 = vld [vmem:[#allocation6 + $0x20] sm:$0xff]  }
  0x9c   : > { %1973 = vmatprep.subr.bf16.mxu0 %v2425_v0 }
  0x9f   : > { %1974 = vmatpush3.bf16.msra.mxu0 %v2178_v48 }
  0xa0   : > { %2005 = vmatprep.subr.bf16.mxu0 %v2425_v0 }
 0x145   : > { %v627_v7 = vpop.f32.mrf.mxu1 }
 0x146   : > { %v628_v18 = vadd.f32 %v1827_v15, %v627_v7  ;;  %v1834_v7 = vld [vmem:[#allocation10] ss:$0 sm:$0xff] }
 0x147   : > { %v1937_v8 = vpop.f32.mrf.mxu1 }
 0x148   : > { %v700_v20 = vpack.c.bf16 %v628_v18, %v628_v18 }
 0x149   : > { %v630_v9 = vpop.f32.mrf.mxu1 }
 0x14b   : > { %v1938_v10 = vpop.f32.mrf.mxu1 }
 0x14d   : > { %v694_v12 = vpop.f32.mrf.mxu1 }
 0x14e   : > { %v695_v13 = vadd.f32 %v1829_v11, %v694_v12 }
 0x14f   : > { %v1945_v14 = vpop.f32.mrf.mxu1 }
 0x150   : > { %v701_v16 = vpack.c.bf16 %v695_v13, %v695_v13 }
 0x151   : > { %v697_v17 = vpop.f32.mrf.mxu1 }
 0x152   : > { %1948 = vmatpush3.bf16.xpose.msra.mxu1 %v701_v16  ;;  %v761_v21 = vsel %vm759_vm4, %v701_v16, 0 }
 0x153   : > { %v1946_v19 = vpop.f32.mrf.mxu1  ;;  %1953 = vmatprep.subr.bf16.mxu1 %v2425_v0 }
 0x159   : > { %1950 = vmatmul.mubr.bf16.vlgmr.msra.gmra.mxu1 %v700_v20 }
 0x15a   : > { %1954 = vmatpush3.bf16.msra.mxu1 %v761_v21  ;;  %1955 = vmatprep.mubr.msk.bf16.mxu1 %vm2426_vm0, %v2425_v0 }
 0x15b   : > { %1979 = vmatprep.subr.bf16.mxu1 %v2425_v0 }
 0x219   : > { %v736_v22 = vpop.f32.mrf.mxu1 }
 0x21a   : > { %v743_v23 = vsel %vm742_vm5, %v736_v22, -inf }
 0x21b   : > { %744 = vmax.xlane.f32.xlu0 %v743_v23  ;;  %v1951_v24 = vpop.f32.mrf.mxu1 }
 0x21c   : > { %v2181_v24 = vld [vmem:[#allocation9 + $0x78] sm:$0xff]  }
 0x21d   : > { %v739_v25 = vpop.f32.mrf.mxu1 }
 0x21e   : > { %v2182_v25 = vld [vmem:[#allocation9 + $0x70] sm:$0xff]  }
 0x21f   : > { %v1952_v26 = vpop.f32.mrf.mxu1 }
 0x220   : > { %v2183_v26 = vld [vmem:[#allocation9 + $0x68] sm:$0xff]  }
 0x2a4   : > { %v745_v27 = vpop.xlane.xlu0 %744 }
 0x2a5   : > { %v746_v28 = vsub.f32 %v736_v22, %v745_v27  ;;  %v2184_v27 = vld [vmem:[#allocation9 + $0x60] sm:$0xff]  }
 0x2a7   : > { %v747_v29 = vmul.f32 1.442695, %v746_v28  ;;  %v2185_v28 = vld [vmem:[#allocation9 + $0x58] sm:$0xff]  }
 0x2a9   : > { %2197 = vpow2.f32 %v747_v29  ;;  %v2186_v29 = vld [vmem:[#allocation9 + $0x50] sm:$0xff]  }
 0x2b6   : > { %v2198_v30 = vpop.eup %2197 }
 0x2b7   : > { %v749_v31 = vsel %vm742_vm5, %v2198_v30, 0.0 }
 0x2b8   : > { %750 = vadd.xlane.f32.xlu0 %v749_v31 }
 0x341   : > { %v751_v39 = vpop.xlane.xlu0 %750 }
 0x342   : > { %2199 = vrcp.f32 %v751_v39  ;;  %v1255_v39 = vld [vmem:[%s561_s28] sm:$0xf] }
 0x34f   : > { %v2200_v40 = vpop.eup %2199 }
 0x350   : > { %v753_v42 = vmul.f32 %v2200_v40, %v2198_v30  ;;  %v2187_v30 = vld [vmem:[#allocation9 + $0x48] sm:$0xff]  }
 0x352   : > { %v754_v43 = vpack.c.bf16 %v753_v42, %v753_v42 }
 0x354   : > { %1956 = vmatmul.mubr.msk.bf16.vlgmr.msra.gmra.mxu1 %vm755_vm6, %v754_v43 }
 0x355   : > { %1980 = vmatpush3.bf16.msra.mxu1 %v929_v44  ;;  %1981 = vmatprep.mubr.msk.bf16.mxu1 %vm2426_vm0, %v2425_v0 }
 0x356   : > { %1985 = vmatprep.subr.bf16.mxu1 %v2425_v0 }
 0x35c   : > { %1982 = vmatmul.mubr.msk.bf16.vlgmr.msra.gmra.mxu1 %vm585_vm2, %v2681_v3 }
 0x35d   : > { %1986 = vmatpush3.bf16.msra.mxu1 %v2169_v45  ;;  %1989 = vmatprep.mubr.msk.bf16.mxu1 %vm2426_vm0, %v2425_v0 }
 0x35e   : > { %1987 = vmatprep.subr.bf16.mxu1 %v2425_v0 }
 0x361   : > { %1988 = vmatpush3.bf16.msra.mxu1 %v2170_v46 }
 0x362   : > { %1993 = vmatprep.subr.bf16.mxu1 %v2425_v0 }
 0x364   : > { %1990 = vmatmul.mubr.msk.bf16.vlgmr.msra.gmra.mxu1 %vm656_vm3, %v917_v47 }
 0x365   : > { %1995 = vmatprep.mubr.msk.bf16.mxu1 %vm2426_vm0, %v2425_v0 }
 0x414   : > { %v797_v49 = vpop.f32.mrf.mxu1 }
 0x415   : > { %v803_v50 = vpack.c.bf16 %v797_v49, %v797_v49  ;;  %v1863_v49 = vld [vmem:[#allocation7 + $0x2] ss:$0 sm:$0xff] }
 0x416   : > { %v1957_v51 = vpop.f32.mrf.mxu1 }
 0x417   : > { %1976 = vmatmul.mubr.bf16.vlgmr.msra.gmra.mxu0 %v803_v50 }
 0x418   : > { %v800_v52 = vpop.f32.mrf.mxu1  ;;  %2021 = vmatprep.mubr.msk.bf16.mxu0 %vm2426_vm0, %v2425_v0  ;;  %2006 = vmatpush3.bf16.msra.mxu0 %v2181_v24 }
 0x419   : > { %2007 = vmatprep.subr.bf16.mxu0 %v2425_v0 }
 0x41a   : > { %v1958_v53 = vpop.f32.mrf.mxu1 }
 0x41b   : > { %v1861_v53 = vld [vmem:[#allocation4 + $0x2] ss:$0 sm:$0xff] }
 0x41c   : > { %v965_v54 = vpop.f32.mrf.mxu1  ;;  %2008 = vmatpush3.bf16.msra.mxu0 %v2182_v25 }
 0x41d   : > { %v966_v2 = vadd.f32 %v1844_v62, %v965_v54  ;;  %2009 = vmatprep.subr.bf16.mxu0 %v2425_v0 }
 0x41e   : > { %v1983_v55 = vpop.f32.mrf.mxu1 }
 0x41f   : > { %v1039_v5 = vpack.c.bf16 %v966_v2, %v966_v2 }
 0x420   : > { %v968_v56 = vpop.f32.mrf.mxu1  ;;  %2010 = vmatpush3.bf16.msra.mxu0 %v2183_v26  ;;  %v2196_v26 = vld [vmem:[#allocation9 + $0x80] sm:$0xff]  }
 0x421   : > { %2011 = vmatprep.subr.bf16.mxu0 %v2425_v0 }
 0x422   : > { %v1984_v57 = vpop.f32.mrf.mxu1 }
 0x424   : > { %v1033_v59 = vpop.f32.mrf.mxu1  ;;  %2012 = vmatpush3.bf16.msra.mxu0 %v2184_v27 }
 0x425   : > { %v1034_v60 = vadd.f32 %v1846_v58, %v1033_v59  ;;  %2013 = vmatprep.subr.bf16.mxu0 %v2425_v0 }
 0x426   : > { %v1991_v61 = vpop.f32.mrf.mxu1 }
 0x427   : > { %v1040_v63 = vpack.c.bf16 %v1034_v60, %v1034_v60  ;;  %v1851_v60 = vld [vmem:[#allocation10 + $0x1] ss:$0 sm:$0xff] }
 0x428   : > { %v1036_v1 = vpop.f32.mrf.mxu1  ;;  %2014 = vmatpush3.bf16.msra.mxu0 %v2185_v28 }
 0x429   : > { %1994 = vmatpush3.bf16.xpose.msra.mxu1 %v1040_v63  ;;  %v1097_v6 = vsel %vm759_vm4, %v1040_v63, 0  ;;  %2015 = vmatprep.subr.bf16.mxu0 %v2425_v0 }
 0x42a   : > { %v1992_v4 = vpop.f32.mrf.mxu1  ;;  %1999 = vmatprep.subr.bf16.mxu1 %v2425_v0 }
 0x42c   : > { %2016 = vmatpush3.bf16.msra.mxu0 %v2186_v29 }
 0x42d   : > { %2017 = vmatprep.subr.bf16.mxu0 %v2425_v0 }
 0x430   : > { %1996 = vmatmul.mubr.bf16.vlgmr.msra.gmra.mxu1 %v1039_v5  ;;  %2018 = vmatpush3.bf16.msra.mxu0 %v2187_v30 }
 0x431   : > { %2000 = vmatpush3.bf16.msra.mxu1 %v1097_v6  ;;  %2001 = vmatprep.mubr.msk.bf16.mxu1 %vm2426_vm0, %v2425_v0 }
 0x432   : > { %2025 = vmatprep.subr.bf16.mxu1 %v2425_v0  ;;  %2019 = vmatprep.subr.bf16.mxu0 %v2425_v0 }
 0x4d7   : > { %v909_v8 = vpop.f32.mrf.mxu0 }
 0x4d8   : > { %v910_v9 = vadd.f32 %v1834_v7, %v909_v8 }
 0x4d9   : > { %v1977_v10 = vpop.f32.mrf.mxu0 }
 0x4da   : > { %v915_v11 = vpack.c.bf16 %v910_v9, %v910_v9 }
 0x4db   : > { %v912_v12 = vpop.f32.mrf.mxu0 }
 0x4dc   : > { %916 = vst [vmem:[%s565_s29] sm:$0x7] %v915_v11 }
 0x4dd   : > { %v1978_v13 = vpop.f32.mrf.mxu0 }
 0x4f0   : > { %v1075_v14 = vpop.f32.mrf.mxu1 }
 0x4f1   : > { %v1081_v15 = vsel %vm742_vm5, %v1075_v14, -inf }
 0x4f2   : > { %1082 = vmax.xlane.f32.xlu1 %v1081_v15  ;;  %v1997_v16 = vpop.f32.mrf.mxu1  ;;  %v2189_v15 = vld [vmem:[#allocation9 + $0xb8] sm:$0xff]  }
 0x4f3   : > { %v2190_v16 = vld [vmem:[#allocation9 + $0xb0] sm:$0xff]  }
 0x4f4   : > { %v1078_v17 = vpop.f32.mrf.mxu1 }
 0x4f5   : > { %v2191_v17 = vld [vmem:[#allocation9 + $0xa8] sm:$0xff]  }
 0x4f6   : > { %v1998_v18 = vpop.f32.mrf.mxu1 }
 0x4f7   : > { %v2192_v18 = vld [vmem:[#allocation9 + $0xa0] sm:$0xff]  }
 0x57b   : > { %v1083_v19 = vpop.xlane.xlu1 %1082 }
 0x57c   : > { %v1084_v20 = vsub.f32 %v1075_v14, %v1083_v19  ;;  %v2193_v19 = vld [vmem:[#allocation9 + $0x98] sm:$0xff]  }
 0x57e   : > { %v1085_v21 = vmul.f32 1.442695, %v1084_v20  ;;  %v2194_v20 = vld [vmem:[#allocation9 + $0x90] sm:$0xff]  }
 0x580   : > { %2201 = vpow2.f32 %v1085_v21  ;;  %v2195_v21 = vld [vmem:[#allocation9 + $0x88] sm:$0xff]  }
 0x58d   : > { %v2202_v22 = vpop.eup %2201 }
 0x58e   : > { %v1087_v23 = vsel %vm742_vm5, %v2202_v22, 0.0 }
 0x58f   : > { %1088 = vadd.xlane.f32.xlu1 %v1087_v23 }
 0x618   : > { %v1089_v31 = vpop.xlane.xlu1 %1088 }
 0x619   : > { %2203 = vrcp.f32 %v1089_v31 }
 0x626   : > { %v2204_v32 = vpop.eup %2203 }
 0x627   : > { %v1091_v34 = vmul.f32 %v2204_v32, %v2202_v22  ;;  %v1868_v32 = vld [vmem:[#allocation10 + $0x2] ss:$0 sm:$0xff] }
 0x629   : > { %v1092_v35 = vpack.c.bf16 %v1091_v34, %v1091_v34 }
 0x62b   : > { %2002 = vmatmul.mubr.msk.bf16.vlgmr.msra.gmra.mxu1 %vm755_vm6, %v1092_v35 }
 0x62c   : > { %2026 = vmatpush3.bf16.msra.mxu1 %v1267_v36  ;;  %2027 = vmatprep.mubr.msk.bf16.mxu1 %vm2426_vm0, %v2425_v0 }
 0x62d   : > { %2031 = vmatprep.subr.bf16.mxu1 %v2425_v0 }
 0x633   : > { %2028 = vmatmul.mubr.msk.bf16.vlgmr.msra.gmra.mxu1 %vm585_vm2, %v2681_v3  ;;  %v2188_v3 = vld [vmem:[#allocation9 + $0x40] sm:$0xff]  }
 0x634   : > { %2032 = vmatpush3.bf16.msra.mxu1 %v2179_v37  ;;  %2035 = vmatprep.mubr.msk.bf16.mxu1 %vm2426_vm0, %v2425_v0 }
 0x635   : > { %2033 = vmatprep.subr.bf16.mxu1 %v2425_v0  ;;  %2020 = vmatpush3.bf16.msra.mxu0 %v2188_v3 }
 0x636   : > { %2051 = vmatprep.subr.bf16.mxu0 %v2425_v0 }
 0x638   : > { %2034 = vmatpush3.bf16.msra.mxu1 %v2180_v38 }
 0x639   : > { %2039 = vmatprep.subr.bf16.mxu1 %v2425_v0 }
 0x63b   : > { %2036 = vmatmul.mubr.msk.bf16.vlgmr.msra.gmra.mxu1 %vm656_vm3, %v1255_v39 }
 0x63c   : > { %2041 = vmatprep.mubr.msk.bf16.mxu1 %vm2426_vm0, %v2425_v0 }
 0x6eb   : > { %v1133_v40 = vpop.f32.mrf.mxu1 }
 0x6ec   : > { %v1139_v41 = vpack.c.bf16 %v1133_v40, %v1133_v40 }
 0x6ed   : > { %v2003_v42 = vpop.f32.mrf.mxu1 }
 0x6ee   : > { %2022 = vmatmul.mubr.bf16.vlgmr.msra.gmra.mxu0 %v1139_v41 }
 0x6ef   : > { %v1136_v43 = vpop.f32.mrf.mxu1  ;;  %2067 = vmatprep.mubr.msk.bf16.mxu0 %vm2426_vm0, %v2425_v0  ;;  %2052 = vmatpush3.bf16.msra.mxu0 %v2189_v15 }
 0x6f0   : > { %2053 = vmatprep.subr.bf16.mxu0 %v2425_v0 }
 0x6f1   : > { %v2004_v44 = vpop.f32.mrf.mxu1 }
 0x6f3   : > { %v1303_v45 = vpop.f32.mrf.mxu1  ;;  %2054 = vmatpush3.bf16.msra.mxu0 %v2190_v16 }
 0x6f4   : > { %v1304_v56 = vadd.f32 %v1861_v53, %v1303_v45  ;;  %2055 = vmatprep.subr.bf16.mxu0 %v2425_v0 }
 0x6f5   : > { %v2029_v46 = vpop.f32.mrf.mxu1 }
 0x6f6   : > { %v1377_v58 = vpack.c.bf16 %v1304_v56, %v1304_v56 }
 0x6f7   : > { %v1306_v47 = vpop.f32.mrf.mxu1  ;;  %2056 = vmatpush3.bf16.msra.mxu0 %v2191_v17 }
 0x6f8   : > { %2057 = vmatprep.subr.bf16.mxu0 %v2425_v0 }
 0x6f9   : > { %v2030_v48 = vpop.f32.mrf.mxu1 }
 0x6fb   : > { %v1371_v50 = vpop.f32.mrf.mxu1  ;;  %2058 = vmatpush3.bf16.msra.mxu0 %v2192_v18 }
 0x6fc   : > { %v1372_v51 = vadd.f32 %v1863_v49, %v1371_v50  ;;  %2059 = vmatprep.subr.bf16.mxu0 %v2425_v0 }
 0x6fd   : > { %v2037_v52 = vpop.f32.mrf.mxu1 }
 0x6fe   : > { %v1378_v54 = vpack.c.bf16 %v1372_v51, %v1372_v51 }
 0x6ff   : > { %v1374_v55 = vpop.f32.mrf.mxu1  ;;  %2060 = vmatpush3.bf16.msra.mxu0 %v2193_v19 }
 0x700   : > { %2040 = vmatpush3.bf16.xpose.msra.mxu1 %v1378_v54  ;;  %v1435_v59 = vsel %vm759_vm4, %v1378_v54, 0  ;;  %2061 = vmatprep.subr.bf16.mxu0 %v2425_v0 }
 0x701   : > { %v2038_v57 = vpop.f32.mrf.mxu1  ;;  %2045 = vmatprep.subr.bf16.mxu1 %v2425_v0 }
 0x703   : > { %2062 = vmatpush3.bf16.msra.mxu0 %v2194_v20 }
 0x704   : > { %2063 = vmatprep.subr.bf16.mxu0 %v2425_v0 }
 0x707   : > { %2042 = vmatmul.mubr.bf16.vlgmr.msra.gmra.mxu1 %v1377_v58  ;;  %2064 = vmatpush3.bf16.msra.mxu0 %v2195_v21 }
 0x708   : > { %2046 = vmatpush3.bf16.msra.mxu1 %v1435_v59  ;;  %2047 = vmatprep.mubr.msk.bf16.mxu1 %vm2426_vm0, %v2425_v0 }
 0x709   : > { %2065 = vmatprep.subr.bf16.mxu0 %v2425_v0 }
 0x70b   : > { %2066 = vmatpush3.bf16.msra.mxu0 %v2196_v26 }
 0x7ae   : > { %v1247_v61 = vpop.f32.mrf.mxu0 }
 0x7af   : > { %v1248_v62 = vadd.f32 %v1851_v60, %v1247_v61 }
 0x7b0   : > { %v2023_v63 = vpop.f32.mrf.mxu0 }
 0x7b1   : > { %v1253_v1 = vpack.c.bf16 %v1248_v62, %v1248_v62 }
 0x7b2   : > { %v1250_v2 = vpop.f32.mrf.mxu0 }
 0x7b3   : > { %1254 = vst [vmem:[%s569_s30] sm:$0x7] %v1253_v1 }
 0x7b4   : > { %v2024_v4 = vpop.f32.mrf.mxu0 }
 0x7c7   : > { %v1413_v5 = vpop.f32.mrf.mxu1 }
 0x7c8   : > { %v1419_v6 = vsel %vm742_vm5, %v1413_v5, -inf }
 0x7c9   : > { %1420 = vmax.xlane.f32.xlu0 %v1419_v6  ;;  %v2043_v7 = vpop.f32.mrf.mxu1 }
 0x7cb   : > { %v1416_v8 = vpop.f32.mrf.mxu1 }
 0x7cd   : > { %v2044_v9 = vpop.f32.mrf.mxu1 }
 0x852   : > { %v1421_v10 = vpop.xlane.xlu0 %1420 }
 0x853   : > { %v1422_v11 = vsub.f32 %v1413_v5, %v1421_v10 }
 0x855   : > { %v1423_v12 = vmul.f32 1.442695, %v1422_v11 }
 0x857   : > { %2205 = vpow2.f32 %v1423_v12 }
 0x864   : > { %v2206_v13 = vpop.eup %2205 }
 0x865   : > { %v1425_v14 = vsel %vm742_vm5, %v2206_v13, 0.0 }
 0x866   : > { %1426 = vadd.xlane.f32.xlu1 %v1425_v14 }
 0x8ef   : > { %v1427_v22 = vpop.xlane.xlu1 %1426 }
 0x8f0   : > { %2207 = vrcp.f32 %v1427_v22 }
 0x8fd   : > { %v2208_v23 = vpop.eup %2207 }
 0x8fe   : > { %v1429_v24 = vmul.f32 %v2208_v23, %v2206_v13 }
 0x900   : > { %v1430_v25 = vpack.c.bf16 %v1429_v24, %v1429_v24 }
 0x902   : > { %2048 = vmatmul.mubr.msk.bf16.vlgmr.msra.gmra.mxu1 %vm755_vm6, %v1430_v25 }
 0x9c2   : > { %v1471_v27 = vpop.f32.mrf.mxu1 }
 0x9c3   : > { %v1477_v28 = vpack.c.bf16 %v1471_v27, %v1471_v27 }
 0x9c4   : > { %v2049_v29 = vpop.f32.mrf.mxu1 }
 0x9c5   : > { %2068 = vmatmul.mubr.bf16.vlgmr.msra.gmra.mxu0 %v1477_v28 }
 0x9c6   : > { %v1474_v30 = vpop.f32.mrf.mxu1 }
 0x9c8   : > { %v2050_v31 = vpop.f32.mrf.mxu1 }
 0xa85   : > { %v1585_v33 = vpop.f32.mrf.mxu0 }
 0xa86   : > { %v1586_v34 = vadd.f32 %v1868_v32, %v1585_v33 }
 0xa87   : > { %v2069_v0 = vpop.f32.mrf.mxu0 }
 0xa88   : > { %v1591_v35 = vpack.c.bf16 %v1586_v34, %v1586_v34 }
 0xa89   : > { %v1588_v36 = vpop.f32.mrf.mxu0 }
 0xa8a   : > { %1592 = vst [vmem:[%s573_s16] sm:$0x7] %v1591_v35 }
 0xa8b   : > { %v2070_v37 = vpop.f32.mrf.mxu0 }
 0xa8c PF: > { %p26_p13 = scmp.ge.s32.totalorder %s2596_s13, 4   ;;  %s2850_s21 = smov %s2405_s22 }
 0xa8d   : > { %s2851_s22 = smov %s2409_s23  ;;  %s2852_s23 = smov %s2607_s14 }
 0xa8e   : > { %s2853_s24 = smov %s2596_s13  ;;  %28 = sbr.rel (!%p26_p13) target bundleno = 10 (0xa), region = 165 }
 0xa93   :  { %1640 = vsyncpa [#allocation3], 1 }
 0xa94   :  { %1642 = vsyncpa [#allocation3 + $0x1], 1 }
 0xa95   :  { %1643 = vsyncpa [#allocation5], 1 }
 0xa96   :  { %1644 = vsyncpa [#allocation8], 1 }
 0xa97   :  { %1645 = vsyncpa [#allocation11], 1 }

</bundles_post_ra>
